<compile_context>
chip_gen: v7x
topology: tpu7x:2x2x1
jax: 0.10.0
libtpu: 0.0.40
codegen_flags: <defaults>
</compile_context>

<pallas_src>
import jax
import jax.numpy as jnp
from jax.experimental import pallas as pl
from jax.experimental.pallas import tpu as pltpu

LN_EPS = 1e-5
IN_FEATURES = 122
POLICY_DIM = 23
VALUE_LANE = POLICY_DIM   # lane of the output slab holding tanh(value)
OUT_LANES = 24            # policy logits in lanes 0:23, value in lane 23

# Row indices inside the packed (16, 128) f32 constants slab.
_PB1, _VB1 = 0, 1                 # linear-1 biases (policy | value), 128 lanes
_PG1, _PBe1 = 2, 3                # policy LN-1 gamma / beta
_VG1, _VBe1 = 4, 5                # value  LN-1 gamma / beta
_PB2, _PG2, _PBe2 = 6, 7, 8       # policy linear-2 bias, LN-2 gamma / beta
_VB2, _VG2, _VBe2 = 9, 10, 11     # value  linear-2 bias, LN-2 gamma / beta (64 lanes)
_VW3, _PB3, _VB3 = 12, 13, 14     # value out weight row (64), policy out bias (23), value out bias (1)
_CONST_ROWS = 16


def _round_up(a, m):
    return ((a + m - 1) // m) * m


def _layernorm(h, gamma, beta):
    # PyTorch nn.LayerNorm semantics: biased variance, eps=1e-5, affine.
    # Two-pass (numerically stable) form; gamma folded into the rsqrt scale.
    mu = jnp.mean(h, axis=-1, keepdims=True)
    d = h - mu
    var = jnp.mean(d * d, axis=-1, keepdims=True)
    return d * (jax.lax.rsqrt(var + LN_EPS) * gamma) + beta


def _nn3_kernel(x_ref, w1_ref, pw2_ref, pw3_ref, vw2_ref, c_ref, out_ref):
    # bf16 matmul operands (f32 accumulation); all elementwise math stays f32.
    x = x_ref[...].astype(jnp.bfloat16)

    # ----- fused layer 1: one (TB,122) x (122,256) MXU pass covers both heads -----
    h1 = jnp.dot(x, w1_ref[...], preferred_element_type=jnp.float32)
    hp = h1[:, :128] + c_ref[_PB1:_PB1 + 1, :]   # policy path (TB, 128)
    hv = h1[:, 128:] + c_ref[_VB1:_VB1 + 1, :]   # value  path (TB, 128)

    # ----- policy head -----
    hp = jnp.maximum(
        _layernorm(hp, c_ref[_PG1:_PG1 + 1, :], c_ref[_PBe1:_PBe1 + 1, :]), 0.0)
    hp = jnp.dot(hp.astype(jnp.bfloat16), pw2_ref[...],
                 preferred_element_type=jnp.float32) + c_ref[_PB2:_PB2 + 1, :]
    hp = jnp.maximum(
        _layernorm(hp, c_ref[_PG2:_PG2 + 1, :], c_ref[_PBe2:_PBe2 + 1, :]), 0.0)
    policy = jnp.dot(hp.astype(jnp.bfloat16), pw3_ref[...],
                     preferred_element_type=jnp.float32)
    policy = policy + c_ref[_PB3:_PB3 + 1, :OUT_LANES]   # lane 23 stays exactly 0

    # ----- value head -----
    hv = jnp.maximum(
        _layernorm(hv, c_ref[_VG1:_VG1 + 1, :], c_ref[_VBe1:_VBe1 + 1, :]), 0.0)
    hv = jnp.dot(hv.astype(jnp.bfloat16), vw2_ref[...],
                 preferred_element_type=jnp.float32) + c_ref[_VB2:_VB2 + 1, :64]
    hv = jnp.maximum(
        _layernorm(hv, c_ref[_VG2:_VG2 + 1, :64], c_ref[_VBe2:_VBe2 + 1, :64]), 0.0)
    # N=1 output matmul as VPU multiply + XLU cross-lane reduction (no MXU waste).
    v = jnp.sum(hv * c_ref[_VW3:_VW3 + 1, :64], axis=-1, keepdims=True)
    v = jnp.tanh(v + c_ref[_VB3:_VB3 + 1, 0:1])

    # ----- lane-dense (TB, 24) output: full store + single 1-lane overwrite -----
    out_ref[...] = policy.astype(out_ref.dtype)
    out_ref[:, VALUE_LANE:VALUE_LANE + 1] = v.astype(out_ref.dtype)


def nn3_forward(x, packed, *, tb=1024):
    """x: (B, 122) float32 -> (value (B, 1), policy (B, 23))."""
    B, F = x.shape
    assert F == IN_FEATURES
    w1, pw2, pw3, vw2, consts = packed

    # Adaptive batch tile: multiple of 8 sublanes, capped at `tb`, >= 2 grid
    # steps when B > 8 (so the "parallel" axis shards across v7x's 2 TCs), and
    # sized to minimize final-tile padding.
    n_steps = max(2 if B > 8 else 1, pl.cdiv(B, tb))
    TB = _round_up(pl.cdiv(B, n_steps), 8)
    B_pad = _round_up(B, TB)

    # Only batch rows are padded (zeros), and only when needed; feature dim
    # stays at 122 — Mosaic masks the unaligned K=122 contraction.
    xp = x if B_pad == B else jnp.pad(x, ((0, B_pad - B), (0, 0)))

    grid = (B_pad // TB,)
    in_specs = [
        pl.BlockSpec((TB, IN_FEATURES), lambda i: (i, 0)),
        # Weights / constants stay VMEM-resident (constant index_maps).
        pl.BlockSpec(w1.shape, lambda i: (0, 0)),
        pl.BlockSpec(pw2.shape, lambda i: (0, 0)),
        pl.BlockSpec(pw3.shape, lambda i: (0, 0)),
        pl.BlockSpec(vw2.shape, lambda i: (0, 0)),
        pl.BlockSpec(consts.shape, lambda i: (0, 0)),
    ]
    out_specs = pl.BlockSpec((TB, OUT_LANES), lambda i: (i, 0))

    out = pl.pallas_call(
        _nn3_kernel,
        out_shape=jax.ShapeDtypeStruct((B_pad, OUT_LANES), jnp.float32),
        grid=grid,
        in_specs=in_specs,
        out_specs=out_specs,
        compiler_params=pltpu.CompilerParams(
            dimension_semantics=("parallel",),     # 2-TC sharding on v7x
            # Only needed if the caller raises tb past ~1024 (v5e's scoped-VMEM
            # default is 16 MiB).
            vmem_limit_bytes=(48 * 1024 * 1024) if TB > 1024 else None,
        ),
    )(xp, w1, pw2, pw3, vw2, consts)

    head = out[:B, :]                       # single slice of the slab
    policy = head[:, :POLICY_DIM]
    value = head[:, VALUE_LANE:VALUE_LANE + 1]
    return value, policy


def init_params(key):
    """Deterministic synthetic init matching NeuralNetwork3's shapes.

    Linear weights stored transposed: (in_features, out_features).
    Biases / LN params stored as (1, N).
    """
    def lin(key, fan_in, fan_out):
        kw, kb = jax.random.split(key)
        bound = 1.0 / jnp.sqrt(fan_in)
        w = jax.random.uniform(kw, (fan_in, fan_out), jnp.float32, -bound, bound)
        b = jax.random.uniform(kb, (1, fan_out), jnp.float32, -bound, bound)
        return w, b

    keys = jax.random.split(key, 6)
    # policy head: 122 -> 128 -> 128 -> 23
    pw1, pb1 = lin(keys[0], 122, 128)
    pw2, pb2 = lin(keys[1], 128, 128)
    pw3, pb3 = lin(keys[2], 128, 23)
    pg1, pB1 = jnp.ones((1, 128), jnp.float32), jnp.zeros((1, 128), jnp.float32)
    pg2, pB2 = jnp.ones((1, 128), jnp.float32), jnp.zeros((1, 128), jnp.float32)
    # value head: 122 -> 128 -> 64 -> 1
    vw1, vb1 = lin(keys[3], 122, 128)
    vw2, vb2 = lin(keys[4], 128, 64)
    vw3, vb3 = lin(keys[5], 64, 1)
    vg1, vB1 = jnp.ones((1, 128), jnp.float32), jnp.zeros((1, 128), jnp.float32)
    vg2, vB2 = jnp.ones((1, 64), jnp.float32), jnp.zeros((1, 64), jnp.float32)

    return (
        pw1, pb1, pg1, pB1,
        pw2, pb2, pg2, pB2,
        pw3, pb3,
        vw1, vb1, vg1, vB1,
        vw2, vb2, vg2, vB2,
        vw3, vb3,
    )


def pack_params(params):
    """Fuse / pack raw params into the layout the kernel consumes."""
    (pw1, pb1, pg1, pB1, pw2, pb2, pg2, pB2, pw3, pb3,
     vw1, vb1, vg1, vB1, vw2, vb2, vg2, vB2, vw3, vb3) = params

    # Fused layer-1 weight, K kept at 122: N = 128 (policy) | 128 (value).
    w1 = jnp.concatenate([pw1, vw1], axis=-1).astype(jnp.bfloat16)      # (122, 256)
    pw2b = pw2.astype(jnp.bfloat16)                                      # (128, 128)
    # Policy output layer lane-padded 23 -> 24 (lane 23 reserved for value).
    pw3p = jnp.zeros((128, OUT_LANES), jnp.float32).at[:, :POLICY_DIM].set(pw3)
    pw3b = pw3p.astype(jnp.bfloat16)                                     # (128, 24)
    vw2b = vw2.astype(jnp.bfloat16)                                      # (128, 64)

    # All (1, N) biases / LN params packed into one f32 (16, 128) slab.
    c = jnp.zeros((_CONST_ROWS, 128), jnp.float32)
    c = c.at[_PB1, :].set(pb1[0])
    c = c.at[_VB1, :].set(vb1[0])
    c = c.at[_PG1, :].set(pg1[0])
    c = c.at[_PBe1, :].set(pB1[0])
    c = c.at[_VG1, :].set(vg1[0])
    c = c.at[_VBe1, :].set(vB1[0])
    c = c.at[_PB2, :].set(pb2[0])
    c = c.at[_PG2, :].set(pg2[0])
    c = c.at[_PBe2, :].set(pB2[0])
    c = c.at[_VB2, :64].set(vb2[0])
    c = c.at[_VG2, :64].set(vg2[0])
    c = c.at[_VBe2, :64].set(vB2[0])
    c = c.at[_VW3, :64].set(vw3[:, 0])
    c = c.at[_PB3, :POLICY_DIM].set(pb3[0])
    c = c.at[_VB3, 0].set(vb3[0, 0])

    return (w1, pw2b, pw3b, vw2b, c)


def _reference(x, params):
    """Pure-JAX f32 reference with PyTorch-matching (two-pass LN) semantics."""
    (pw1, pb1, pg1, pB1, pw2, pb2, pg2, pB2, pw3, pb3,
     vw1, vb1, vg1, vB1, vw2, vb2, vg2, vB2, vw3, vb3) = params

    def ln(h, g, b):
        mu = jnp.mean(h, axis=-1, keepdims=True)
        var = jnp.mean((h - mu) ** 2, axis=-1, keepdims=True)
        return (h - mu) * jax.lax.rsqrt(var + LN_EPS) * g + b

    h = jnp.maximum(ln(x @ pw1 + pb1, pg1, pB1), 0.0)
    h = jnp.maximum(ln(h @ pw2 + pb2, pg2, pB2), 0.0)
    policy = h @ pw3 + pb3

    g = jnp.maximum(ln(x @ vw1 + vb1, vg1, vB1), 0.0)
    g = jnp.maximum(ln(g @ vw2 + vb2, vg2, vB2), 0.0)
    value = jnp.tanh(g @ vw3 + vb3)
    return value, policy


if __name__ == "__main__":
    key = jax.random.PRNGKey(0)
    kx, kp = jax.random.split(key)

    params = init_params(kp)
    packed = pack_params(params)

    # bf16 matmul operands (f32 accumulation) -> looser-than-f32 tolerance.
    TOL = 5e-2

    # Case 1: small aligned batch (single grid step).
    B = 8
    x = jax.random.normal(kx, (B, IN_FEATURES), jnp.float32)
    value, policy = nn3_forward(x, packed)
    jax.block_until_ready((value, policy))
    assert value.shape == (B, 1) and policy.shape == (B, POLICY_DIM)
    v_ref, p_ref = _reference(x, params)
    assert jnp.allclose(value, v_ref, atol=TOL, rtol=TOL), "value mismatch (B=8)"
    assert jnp.allclose(policy, p_ref, atol=TOL, rtol=TOL), "policy mismatch (B=8)"

    # Case 2: ragged batch (row padding + 2-step parallel grid).
    B2 = 13
    x2 = jax.random.normal(jax.random.PRNGKey(1), (B2, IN_FEATURES), jnp.float32)
    value2, policy2 = nn3_forward(x2, packed)
    jax.block_until_ready((value2, policy2))
    assert value2.shape == (B2, 1) and policy2.shape == (B2, POLICY_DIM)
    v_ref2, p_ref2 = _reference(x2, params)
    assert jnp.allclose(value2, v_ref2, atol=TOL, rtol=TOL), "value mismatch (B=13)"
    assert jnp.allclose(policy2, p_ref2, atol=TOL, rtol=TOL), "policy mismatch (B=13)"

    print("KERNEL_OK")
</pallas_src>

<mosaic_0001>
module attributes {stable_mosaic.version = 11 : i64} {
  func.func @_nn3_kernel(%arg0: i32, %arg1: memref<8x122xf32, #tpu.memory_space<vmem>>, %arg2: memref<122x256xbf16, #tpu.memory_space<vmem>>, %arg3: memref<128x128xbf16, #tpu.memory_space<vmem>>, %arg4: memref<128x24xbf16, #tpu.memory_space<vmem>>, %arg5: memref<128x64xbf16, #tpu.memory_space<vmem>>, %arg6: memref<16x128xf32, #tpu.memory_space<vmem>>, %arg7: memref<8x24xf32, #tpu.memory_space<vmem>>) attributes {dimension_semantics = [#tpu.dimension_semantics<parallel>], iteration_bounds = array<i64: 1>, scalar_prefetch = 0 : i64, scratch_operands = 0 : i64, tpu.core_type = #tpu.core_type<tc>, window_params = [{transform_indices = @transform_0, window_bounds = array<i64: 8, 122>}, {pipeline_mode = #tpu.pipeline_mode<synchronous>, transform_indices = @transform_1, window_bounds = array<i64: 122, 256>}, {pipeline_mode = #tpu.pipeline_mode<synchronous>, transform_indices = @transform_2, window_bounds = array<i64: 128, 128>}, {pipeline_mode = #tpu.pipeline_mode<synchronous>, transform_indices = @transform_3, window_bounds = array<i64: 128, 24>}, {pipeline_mode = #tpu.pipeline_mode<synchronous>, transform_indices = @transform_4, window_bounds = array<i64: 128, 64>}, {pipeline_mode = #tpu.pipeline_mode<synchronous>, transform_indices = @transform_5, window_bounds = array<i64: 16, 128>}, {transform_indices = @transform_6, window_bounds = array<i64: 8, 24>}]} {
    %c0 = arith.constant 0 : index
    %c0_0 = arith.constant 0 : index
    %0 = vector.load %arg1[%c0, %c0_0] : memref<8x122xf32, #tpu.memory_space<vmem>>, vector<8x122xf32>
    %1 = arith.truncf %0 : vector<8x122xf32> to vector<8x122xbf16>
    %c0_1 = arith.constant 0 : index
    %c0_2 = arith.constant 0 : index
    %2 = vector.load %arg2[%c0_1, %c0_2] : memref<122x256xbf16, #tpu.memory_space<vmem>>, vector<122x256xbf16>
    %cst = arith.constant dense<0.000000e+00> : vector<8x256xf32>
    %3 = tpu.matmul %1, %2, %cst {dimension_numbers = #tpu.dot_dimension_numbers<[1], [0], [0], [1], [0, 0, 1, 1], [], []>} : vector<8x122xbf16>, vector<122x256xbf16>, vector<8x256xf32> -> vector<8x256xf32>
    %4 = vector.extract_strided_slice %3 {offsets = [0, 0], sizes = [8, 128], strides = [1, 1]} : vector<8x256xf32> to vector<8x128xf32>
    %c0_3 = arith.constant 0 : index
    %c0_4 = arith.constant 0 : index
    %5 = vector.load %arg6[%c0_3, %c0_4] : memref<16x128xf32, #tpu.memory_space<vmem>>, vector<1x128xf32>
    %6 = vector.broadcast %5 : vector<1x128xf32> to vector<8x128xf32>
    %7 = arith.addf %4, %6 : vector<8x128xf32>
    %8 = vector.extract_strided_slice %3 {offsets = [0, 128], sizes = [8, 128], strides = [1, 1]} : vector<8x256xf32> to vector<8x128xf32>
    %c1 = arith.constant 1 : index
    %c0_5 = arith.constant 0 : index
    %9 = vector.load %arg6[%c1, %c0_5] : memref<16x128xf32, #tpu.memory_space<vmem>>, vector<1x128xf32>
    %10 = vector.broadcast %9 : vector<1x128xf32> to vector<8x128xf32>
    %11 = arith.addf %8, %10 : vector<8x128xf32>
    %c2 = arith.constant 2 : index
    %c0_6 = arith.constant 0 : index
    %12 = vector.load %arg6[%c2, %c0_6] : memref<16x128xf32, #tpu.memory_space<vmem>>, vector<1x128xf32>
    %c3 = arith.constant 3 : index
    %c0_7 = arith.constant 0 : index
    %13 = vector.load %arg6[%c3, %c0_7] : memref<16x128xf32, #tpu.memory_space<vmem>>, vector<1x128xf32>
    %cst_8 = arith.constant dense<0.000000e+00> : vector<8xf32>
    %14 = vector.multi_reduction <add>, %7, %cst_8 [1] : vector<8x128xf32> to vector<8xf32>
    %15 = vector.shape_cast %14 : vector<8xf32> to vector<8x1xf32>
    %cst_9 = arith.constant 1.280000e+02 : f32
    %16 = vector.broadcast %cst_9 : f32 to vector<8x1xf32>
    %17 = arith.divf %15, %16 : vector<8x1xf32>
    %18 = vector.broadcast %17 : vector<8x1xf32> to vector<8x128xf32>
    %19 = arith.subf %7, %18 : vector<8x128xf32>
    %20 = arith.mulf %19, %19 : vector<8x128xf32>
    %cst_10 = arith.constant dense<0.000000e+00> : vector<8xf32>
    %21 = vector.multi_reduction <add>, %20, %cst_10 [1] : vector<8x128xf32> to vector<8xf32>
    %22 = vector.shape_cast %21 : vector<8xf32> to vector<8x1xf32>
    %cst_11 = arith.constant 1.280000e+02 : f32
    %23 = vector.broadcast %cst_11 : f32 to vector<8x1xf32>
    %24 = arith.divf %22, %23 : vector<8x1xf32>
    %cst_12 = arith.constant 9.99999974E-6 : f32
    %25 = vector.broadcast %cst_12 : f32 to vector<8x1xf32>
    %26 = arith.addf %24, %25 : vector<8x1xf32>
    %27 = math.rsqrt %26 : vector<8x1xf32>
    %28 = vector.broadcast %27 : vector<8x1xf32> to vector<8x128xf32>
    %29 = vector.broadcast %12 : vector<1x128xf32> to vector<8x128xf32>
    %30 = arith.mulf %28, %29 : vector<8x128xf32>
    %31 = arith.mulf %19, %30 : vector<8x128xf32>
    %32 = vector.broadcast %13 : vector<1x128xf32> to vector<8x128xf32>
    %33 = arith.addf %31, %32 : vector<8x128xf32>
    %cst_13 = arith.constant 0.000000e+00 : f32
    %34 = vector.broadcast %cst_13 : f32 to vector<8x128xf32>
    %35 = arith.maximumf %33, %34 : vector<8x128xf32>
    %36 = arith.truncf %35 : vector<8x128xf32> to vector<8x128xbf16>
    %c0_14 = arith.constant 0 : index
    %c0_15 = arith.constant 0 : index
    %37 = vector.load %arg3[%c0_14, %c0_15] : memref<128x128xbf16, #tpu.memory_space<vmem>>, vector<128x128xbf16>
    %cst_16 = arith.constant dense<0.000000e+00> : vector<8x128xf32>
    %38 = tpu.matmul %36, %37, %cst_16 {dimension_numbers = #tpu.dot_dimension_numbers<[1], [0], [0], [1], [0, 0, 1, 1], [], []>} : vector<8x128xbf16>, vector<128x128xbf16>, vector<8x128xf32> -> vector<8x128xf32>
    %c6 = arith.constant 6 : index
    %c0_17 = arith.constant 0 : index
    %39 = vector.load %arg6[%c6, %c0_17] : memref<16x128xf32, #tpu.memory_space<vmem>>, vector<1x128xf32>
    %40 = vector.broadcast %39 : vector<1x128xf32> to vector<8x128xf32>
    %41 = arith.addf %38, %40 : vector<8x128xf32>
    %c7 = arith.constant 7 : index
    %c0_18 = arith.constant 0 : index
    %42 = vector.load %arg6[%c7, %c0_18] : memref<16x128xf32, #tpu.memory_space<vmem>>, vector<1x128xf32>
    %c8 = arith.constant 8 : index
    %c0_19 = arith.constant 0 : index
    %43 = vector.load %arg6[%c8, %c0_19] : memref<16x128xf32, #tpu.memory_space<vmem>>, vector<1x128xf32>
    %cst_20 = arith.constant dense<0.000000e+00> : vector<8xf32>
    %44 = vector.multi_reduction <add>, %41, %cst_20 [1] : vector<8x128xf32> to vector<8xf32>
    %45 = vector.shape_cast %44 : vector<8xf32> to vector<8x1xf32>
    %cst_21 = arith.constant 1.280000e+02 : f32
    %46 = vector.broadcast %cst_21 : f32 to vector<8x1xf32>
    %47 = arith.divf %45, %46 : vector<8x1xf32>
    %48 = vector.broadcast %47 : vector<8x1xf32> to vector<8x128xf32>
    %49 = arith.subf %41, %48 : vector<8x128xf32>
    %50 = arith.mulf %49, %49 : vector<8x128xf32>
    %cst_22 = arith.constant dense<0.000000e+00> : vector<8xf32>
    %51 = vector.multi_reduction <add>, %50, %cst_22 [1] : vector<8x128xf32> to vector<8xf32>
    %52 = vector.shape_cast %51 : vector<8xf32> to vector<8x1xf32>
    %cst_23 = arith.constant 1.280000e+02 : f32
    %53 = vector.broadcast %cst_23 : f32 to vector<8x1xf32>
    %54 = arith.divf %52, %53 : vector<8x1xf32>
    %cst_24 = arith.constant 9.99999974E-6 : f32
    %55 = vector.broadcast %cst_24 : f32 to vector<8x1xf32>
    %56 = arith.addf %54, %55 : vector<8x1xf32>
    %57 = math.rsqrt %56 : vector<8x1xf32>
    %58 = vector.broadcast %57 : vector<8x1xf32> to vector<8x128xf32>
    %59 = vector.broadcast %42 : vector<1x128xf32> to vector<8x128xf32>
    %60 = arith.mulf %58, %59 : vector<8x128xf32>
    %61 = arith.mulf %49, %60 : vector<8x128xf32>
    %62 = vector.broadcast %43 : vector<1x128xf32> to vector<8x128xf32>
    %63 = arith.addf %61, %62 : vector<8x128xf32>
    %cst_25 = arith.constant 0.000000e+00 : f32
    %64 = vector.broadcast %cst_25 : f32 to vector<8x128xf32>
    %65 = arith.maximumf %63, %64 : vector<8x128xf32>
    %66 = arith.truncf %65 : vector<8x128xf32> to vector<8x128xbf16>
    %c0_26 = arith.constant 0 : index
    %c0_27 = arith.constant 0 : index
    %67 = vector.load %arg4[%c0_26, %c0_27] : memref<128x24xbf16, #tpu.memory_space<vmem>>, vector<128x24xbf16>
    %cst_28 = arith.constant dense<0.000000e+00> : vector<8x24xf32>
    %68 = tpu.matmul %66, %67, %cst_28 {dimension_numbers = #tpu.dot_dimension_numbers<[1], [0], [0], [1], [0, 0, 1, 1], [], []>} : vector<8x128xbf16>, vector<128x24xbf16>, vector<8x24xf32> -> vector<8x24xf32>
    %c13 = arith.constant 13 : index
    %c0_29 = arith.constant 0 : index
    %69 = vector.load %arg6[%c13, %c0_29] : memref<16x128xf32, #tpu.memory_space<vmem>>, vector<1x24xf32>
    %70 = vector.broadcast %69 : vector<1x24xf32> to vector<8x24xf32>
    %71 = arith.addf %68, %70 : vector<8x24xf32>
    %c4 = arith.constant 4 : index
    %c0_30 = arith.constant 0 : index
    %72 = vector.load %arg6[%c4, %c0_30] : memref<16x128xf32, #tpu.memory_space<vmem>>, vector<1x128xf32>
    %c5 = arith.constant 5 : index
    %c0_31 = arith.constant 0 : index
    %73 = vector.load %arg6[%c5, %c0_31] : memref<16x128xf32, #tpu.memory_space<vmem>>, vector<1x128xf32>
    %cst_32 = arith.constant dense<0.000000e+00> : vector<8xf32>
    %74 = vector.multi_reduction <add>, %11, %cst_32 [1] : vector<8x128xf32> to vector<8xf32>
    %75 = vector.shape_cast %74 : vector<8xf32> to vector<8x1xf32>
    %cst_33 = arith.constant 1.280000e+02 : f32
    %76 = vector.broadcast %cst_33 : f32 to vector<8x1xf32>
    %77 = arith.divf %75, %76 : vector<8x1xf32>
    %78 = vector.broadcast %77 : vector<8x1xf32> to vector<8x128xf32>
    %79 = arith.subf %11, %78 : vector<8x128xf32>
    %80 = arith.mulf %79, %79 : vector<8x128xf32>
    %cst_34 = arith.constant dense<0.000000e+00> : vector<8xf32>
    %81 = vector.multi_reduction <add>, %80, %cst_34 [1] : vector<8x128xf32> to vector<8xf32>
    %82 = vector.shape_cast %81 : vector<8xf32> to vector<8x1xf32>
    %cst_35 = arith.constant 1.280000e+02 : f32
    %83 = vector.broadcast %cst_35 : f32 to vector<8x1xf32>
    %84 = arith.divf %82, %83 : vector<8x1xf32>
    %cst_36 = arith.constant 9.99999974E-6 : f32
    %85 = vector.broadcast %cst_36 : f32 to vector<8x1xf32>
    %86 = arith.addf %84, %85 : vector<8x1xf32>
    %87 = math.rsqrt %86 : vector<8x1xf32>
    %88 = vector.broadcast %87 : vector<8x1xf32> to vector<8x128xf32>
    %89 = vector.broadcast %72 : vector<1x128xf32> to vector<8x128xf32>
    %90 = arith.mulf %88, %89 : vector<8x128xf32>
    %91 = arith.mulf %79, %90 : vector<8x128xf32>
    %92 = vector.broadcast %73 : vector<1x128xf32> to vector<8x128xf32>
    %93 = arith.addf %91, %92 : vector<8x128xf32>
    %cst_37 = arith.constant 0.000000e+00 : f32
    %94 = vector.broadcast %cst_37 : f32 to vector<8x128xf32>
    %95 = arith.maximumf %93, %94 : vector<8x128xf32>
    %96 = arith.truncf %95 : vector<8x128xf32> to vector<8x128xbf16>
    %c0_38 = arith.constant 0 : index
    %c0_39 = arith.constant 0 : index
    %97 = vector.load %arg5[%c0_38, %c0_39] : memref<128x64xbf16, #tpu.memory_space<vmem>>, vector<128x64xbf16>
    %cst_40 = arith.constant dense<0.000000e+00> : vector<8x64xf32>
    %98 = tpu.matmul %96, %97, %cst_40 {dimension_numbers = #tpu.dot_dimension_numbers<[1], [0], [0], [1], [0, 0, 1, 1], [], []>} : vector<8x128xbf16>, vector<128x64xbf16>, vector<8x64xf32> -> vector<8x64xf32>
    %c9 = arith.constant 9 : index
    %c0_41 = arith.constant 0 : index
    %99 = vector.load %arg6[%c9, %c0_41] : memref<16x128xf32, #tpu.memory_space<vmem>>, vector<1x64xf32>
    %100 = vector.broadcast %99 : vector<1x64xf32> to vector<8x64xf32>
    %101 = arith.addf %98, %100 : vector<8x64xf32>
    %c10 = arith.constant 10 : index
    %c0_42 = arith.constant 0 : index
    %102 = vector.load %arg6[%c10, %c0_42] : memref<16x128xf32, #tpu.memory_space<vmem>>, vector<1x64xf32>
    %c11 = arith.constant 11 : index
    %c0_43 = arith.constant 0 : index
    %103 = vector.load %arg6[%c11, %c0_43] : memref<16x128xf32, #tpu.memory_space<vmem>>, vector<1x64xf32>
    %cst_44 = arith.constant dense<0.000000e+00> : vector<8xf32>
    %104 = vector.multi_reduction <add>, %101, %cst_44 [1] : vector<8x64xf32> to vector<8xf32>
    %105 = vector.shape_cast %104 : vector<8xf32> to vector<8x1xf32>
    %cst_45 = arith.constant 6.400000e+01 : f32
    %106 = vector.broadcast %cst_45 : f32 to vector<8x1xf32>
    %107 = arith.divf %105, %106 : vector<8x1xf32>
    %108 = vector.broadcast %107 : vector<8x1xf32> to vector<8x64xf32>
    %109 = arith.subf %101, %108 : vector<8x64xf32>
    %110 = arith.mulf %109, %109 : vector<8x64xf32>
    %cst_46 = arith.constant dense<0.000000e+00> : vector<8xf32>
    %111 = vector.multi_reduction <add>, %110, %cst_46 [1] : vector<8x64xf32> to vector<8xf32>
    %112 = vector.shape_cast %111 : vector<8xf32> to vector<8x1xf32>
    %cst_47 = arith.constant 6.400000e+01 : f32
    %113 = vector.broadcast %cst_47 : f32 to vector<8x1xf32>
    %114 = arith.divf %112, %113 : vector<8x1xf32>
    %cst_48 = arith.constant 9.99999974E-6 : f32
    %115 = vector.broadcast %cst_48 : f32 to vector<8x1xf32>
    %116 = arith.addf %114, %115 : vector<8x1xf32>
    %117 = math.rsqrt %116 : vector<8x1xf32>
    %118 = vector.broadcast %117 : vector<8x1xf32> to vector<8x64xf32>
    %119 = vector.broadcast %102 : vector<1x64xf32> to vector<8x64xf32>
    %120 = arith.mulf %118, %119 : vector<8x64xf32>
    %121 = arith.mulf %109, %120 : vector<8x64xf32>
    %122 = vector.broadcast %103 : vector<1x64xf32> to vector<8x64xf32>
    %123 = arith.addf %121, %122 : vector<8x64xf32>
    %cst_49 = arith.constant 0.000000e+00 : f32
    %124 = vector.broadcast %cst_49 : f32 to vector<8x64xf32>
    %125 = arith.maximumf %123, %124 : vector<8x64xf32>
    %c12 = arith.constant 12 : index
    %c0_50 = arith.constant 0 : index
    %126 = vector.load %arg6[%c12, %c0_50] : memref<16x128xf32, #tpu.memory_space<vmem>>, vector<1x64xf32>
    %127 = vector.broadcast %126 : vector<1x64xf32> to vector<8x64xf32>
    %128 = arith.mulf %125, %127 : vector<8x64xf32>
    %cst_51 = arith.constant dense<0.000000e+00> : vector<8xf32>
    %129 = vector.multi_reduction <add>, %128, %cst_51 [1] : vector<8x64xf32> to vector<8xf32>
    %130 = vector.shape_cast %129 : vector<8xf32> to vector<8x1xf32>
    %c14 = arith.constant 14 : index
    %c0_52 = arith.constant 0 : index
    %131 = vector.load %arg6[%c14, %c0_52] : memref<16x128xf32, #tpu.memory_space<vmem>>, vector<1x1xf32>
    %132 = vector.broadcast %131 : vector<1x1xf32> to vector<8x1xf32>
    %133 = arith.addf %130, %132 : vector<8x1xf32>
    %134 = math.tanh %133 : vector<8x1xf32>
    %c0_53 = arith.constant 0 : index
    %c0_54 = arith.constant 0 : index
    %135 = vector.load %arg7[%c0_53, %c0_54] : memref<8x24xf32, #tpu.memory_space<vmem>>, vector<8x24xf32>
    tpu.vector_store %arg7[%c0_53, %c0_54], %71 {strides = array<i32>} : memref<8x24xf32, #tpu.memory_space<vmem>>, vector<8x24xf32>,
    %c0_55 = arith.constant 0 : index
    %c23 = arith.constant 23 : index
    %136 = vector.load %arg7[%c0_55, %c23] : memref<8x24xf32, #tpu.memory_space<vmem>>, vector<8x1xf32>
    tpu.vector_store %arg7[%c0_55, %c23], %134 {strides = array<i32>} : memref<8x24xf32, #tpu.memory_space<vmem>>, vector<8x1xf32>,
    return
  }
  func.func @transform_0(%arg0: i32) -> (i32, i32) {
    %c0_i32 = arith.constant 0 : i32
    %c0_i32_0 = arith.constant 0 : i32
    return %arg0, %c0_i32 : i32, i32
  }
  func.func @transform_1(%arg0: i32) -> (i32, i32) {
    %c0_i32 = arith.constant 0 : i32
    %c0_i32_0 = arith.constant 0 : i32
    %c0_i32_1 = arith.constant 0 : i32
    return %c0_i32, %c0_i32_0 : i32, i32
  }
  func.func @transform_2(%arg0: i32) -> (i32, i32) {
    %c0_i32 = arith.constant 0 : i32
    %c0_i32_0 = arith.constant 0 : i32
    %c0_i32_1 = arith.constant 0 : i32
    return %c0_i32, %c0_i32_0 : i32, i32
  }
  func.func @transform_3(%arg0: i32) -> (i32, i32) {
    %c0_i32 = arith.constant 0 : i32
    %c0_i32_0 = arith.constant 0 : i32
    %c0_i32_1 = arith.constant 0 : i32
    return %c0_i32, %c0_i32_0 : i32, i32
  }
  func.func @transform_4(%arg0: i32) -> (i32, i32) {
    %c0_i32 = arith.constant 0 : i32
    %c0_i32_0 = arith.constant 0 : i32
    %c0_i32_1 = arith.constant 0 : i32
    return %c0_i32, %c0_i32_0 : i32, i32
  }
  func.func @transform_5(%arg0: i32) -> (i32, i32) {
    %c0_i32 = arith.constant 0 : i32
    %c0_i32_0 = arith.constant 0 : i32
    %c0_i32_1 = arith.constant 0 : i32
    return %c0_i32, %c0_i32_0 : i32, i32
  }
  func.func @transform_6(%arg0: i32) -> (i32, i32) {
    %c0_i32 = arith.constant 0 : i32
    %c0_i32_0 = arith.constant 0 : i32
    return %arg0, %c0_i32 : i32, i32
  }
}

</mosaic_0001>

<bundles_post_ra>
// kernel: tpu_custom_call.1
= control target key start
LH: loop header
LB: loop body
LE: loop exit
PB: predicated region body
PF: predicated region fallthrough
CT: control target
= control target key end

     0   :  { %11 = vsyncpa [#allocation3], 0  ;;  %s1226_s0 = inlined_call_operand.hbm [shape: f32[8,122], index: 0, kind: input, shape index: {}]   ;;  %s1227_s1 = inlined_call_operand.vmem [shape: bf16[122,256], index: 1, kind: input, shape index: {}]   ;;  %s1228_s2 = inlined_call_operand.hbm [shape: bf16[128,128], index: 2, kind: input, shape index: {}]   ;;  %s1229_s3 = inlined_call_operand.vmem [shape: bf16[128,24], index: 3, kind: input, shape index: {}]   ;;  %s1230_s4 = inlined_call_operand.vmem [shape: bf16[128,64], index: 4, kind: input, shape index: {}]   ;;  %s1231_s5 = inlined_call_operand.vmem [shape: f32[16,128], index: 5, kind: input, shape index: {}]   ;;  %s1232_s6 = inlined_call_operand.hbm [shape: f32[8,24], index: 6, kind: output, shape index: {}]  }
   0x1   :  { %12 = vsyncpa [#allocation6], 0 }
   0x2   :  { %13 = vsyncpa [#allocation4], 0  ;;  %s965_s21 = smov [#allocation2]   ;;  %s966_s23 = smov [#allocation5]  }
   0x3   :  { %s20_s22 = sshll.u32 %s965_s21, 4  ;;  %s31_s24 = sshll.u32 %s966_s23, 4  ;;  %s21_s22 = int_to_ptr.vmem [resolvable:$true] %s20_s22  ;;  %s1009_s24 = int_to_ptr.vmem [resolvable:$true] %s31_s24 }
   0x4   :  { %s893_s27 = scalar_lea.hbm %s1226_s0, 128 }
   0x5   :  { %p894_p0 = scmp.ne.s32.totalorder %s1226_s0, %s893_s27  ;;  %p897_p1 = scmp.lt.u32.totalorder %s893_s27, %s1226_s0 }
   0x7   :  { %p899_p2 = pnand %p897_p1, %p894_p0 }
   0x9   :  { %902 = shalt.err (!%p899_p2)
}
   0xa   :  { %s903_s8 = scalar_lea.vmem %s21_s22, 128  ;;  %p908_p4 = scmp.lt.s32.totalorder %s21_s22, %s21_s22 }
   0xb   :  { %p904_p3 = scmp.ne.s32.totalorder %s21_s22, %s903_s8  ;;  %p909_p5 = scmp.lt.s32.totalorder %s903_s8, %s903_s8 }
   0xd   :  { %p910_p6 = por %p909_p5, %p908_p4 }
   0xf   :  { %p911_p7 = pnand %p910_p6, %p904_p3 }
  0x11   :  { %914 = shalt.err (!%p911_p7)
}
  0x12   :  { %23 = dma.hbm_to_vmem [thread:$0]  %s1226_s0, 128, %s21_s22, [#allocation3]  }
  0x13   :  { %s915_s13 = scalar_lea.hbm %s1228_s2, 1024 }
  0x14   :  { %p916_p8 = scmp.ne.s32.totalorder %s1228_s2, %s915_s13  ;;  %p919_p9 = scmp.lt.u32.totalorder %s915_s13, %s1228_s2 }
  0x16   :  { %p921_p10 = pnand %p919_p9, %p916_p8 }
  0x18   :  { %924 = shalt.err (!%p921_p10)
}
  0x19   :  { %s925_s18 = scalar_lea.vmem %s1009_s24, 1024  ;;  %p930_p12 = scmp.lt.s32.totalorder %s1009_s24, %s1009_s24 }
  0x1a   :  { %p926_p11 = scmp.ne.s32.totalorder %s1009_s24, %s925_s18  ;;  %p931_p13 = scmp.lt.s32.totalorder %s925_s18, %s925_s18 }
  0x1c   :  { %p932_p0 = por %p931_p13, %p930_p12 }
  0x1e   :  { %p933_p1 = pnand %p932_p0, %p926_p11 }
  0x20   :  { %936 = shalt.err (!%p933_p1)
}
  0x21   :  { %s967_s0 = smov 64   ;;  %s968_s19 = smov 4  }
  0x22   :  { %37 = dma.hbm_to_vmem [thread:$0]  %s1228_s2, 1024, %s1009_s24, [#allocation6], %s967_s0, %s967_s0, %s968_s19  }
  0x23   :  { %959 = dma.done.wait [#allocation3], 128  }
  0x24   :  { %960 = vsyncadd [#allocation3], 4294967168 }
  0x25   :  { %961 = dma.done.wait [#allocation6], 1024  }
  0x26   :  { %962 = vsyncadd [#allocation6], 4294966272  ;;  %v969_v0 = vmov 0   ;;  %v835_v1 = vld [vmem:[%s1227_s1 + $0x4] ss:$8 sps:$4 sm:$0xff]   ;;  %vm151_vm0 = vcmask 1044480  }
  0x27   :  { %190 = vmatprep.mubr.bf16.mxu0 %v969_v0  ;;  %v837_v2 = vld [vmem:[%s1227_s1] ss:$8 sps:$4 sm:$0xff]   ;;  %158 = vmatprep.subr.bf16.mxu0 %v835_v1  ;;  %v838_v3 = vld [vmem:[%s1227_s1 + $0x14] ss:$8 sps:$4 sm:$0xff]   ;;  %v840_v4 = vld [vmem:[%s1227_s1 + $0x10] ss:$8 sps:$4 sm:$0xff]  }
  0x28   :  { %159 = vmatpush1.bf16.msra.mxu0 %v837_v2  ;;  %v841_v5 = vld [vmem:[%s1227_s1 + $0x24] ss:$8 sps:$4 sm:$0xff]   ;;  %v843_v6 = vld [vmem:[%s1227_s1 + $0x20] ss:$8 sps:$4 sm:$0xff]   ;;  %v844_v7 = vld [vmem:[%s1227_s1 + $0x34] ss:$8 sps:$4 sm:$0xff]  }
  0x29   :  { %160 = vmatprep.subr.bf16.mxu0 %v838_v3  ;;  %v846_v8 = vld [vmem:[%s1227_s1 + $0x30] ss:$8 sps:$4 sm:$0xff]   ;;  %v847_v9 = vld [vmem:[%s1227_s1 + $0x44] ss:$8 sps:$4 sm:$0xff]   ;;  %v849_v10 = vld [vmem:[%s1227_s1 + $0x40] ss:$8 sps:$4 sm:$0xff]  }
  0x2a   :  { %v850_v11 = vld [vmem:[%s1227_s1 + $0x54] ss:$8 sps:$4 sm:$0xff]   ;;  %v852_v12 = vld [vmem:[%s1227_s1 + $0x50] ss:$8 sps:$4 sm:$0xff]   ;;  %v853_v13 = vld [vmem:[%s1227_s1 + $0x64] ss:$8 sps:$4 sm:$0xff]  }
  0x2b   :  { %v855_v14 = vld [vmem:[%s1227_s1 + $0x60] ss:$8 sps:$4 sm:$0xff]   ;;  %v856_v15 = vld [vmem:[%s1227_s1 + $0x74] ss:$8 sps:$4 sm:$0x1f]   ;;  %vm147_vm1 = vcmask 998400  }
  0x2c   :  { %161 = vmatpush1.bf16.msra.mxu0 %v840_v4  ;;  %v858_v16 = vld [vmem:[%s1227_s1 + $0x70] ss:$8 sps:$4 sm:$0x1f]   ;;  %v51_v17 = vld [vmem:[#allocation2] sm:$0xff]  ;;  %v859_v28 = vld [vmem:[#allocation5] sm:$0xff]   ;;  %v970_v29 = vmov 0.0  }
  0x2d   :  { %162 = vmatprep.subr.bf16.mxu0 %v841_v5  ;;  %v153_v18 = vsel %vm151_vm0, %v858_v16, 0  ;;  %v52_v19 = vpack.c.bf16 %v51_v17, %v51_v17  ;;  %v700_v20 = vld [vmem:[%s1231_s5] ss:$0 sm:$0xff]  ;;  %v701_v24 = vld [vmem:[%s1231_s5 + $0x1] ss:$0 sm:$0xff]  ;;  %766 = vmatprep.subr.bf16.mxu1 %v970_v29  ;;  %v860_v30 = vld [vmem:[#allocation5 + $0x8] sm:$0xff]  }
  0x2e   :  { %767 = vmatpush3.bf16.msra.mxu1 %v859_v28  ;;  %v861_v39 = vld [vmem:[#allocation5 + $0x10] sm:$0xff]   ;;  %v862_v40 = vld [vmem:[#allocation5 + $0x18] sm:$0xff]   ;;  %v863_v41 = vld [vmem:[#allocation5 + $0x20] sm:$0xff]   ;;  %vm971_vm2 = vmmov 0   ;;  %vm616_vm3 = vcmask 523264   ;;  %s972_s1 = smov 23  }
  0x2f   :  { %768 = vmatprep.subr.bf16.mxu1 %v970_v29  ;;  %v864_v42 = vld [vmem:[#allocation5 + $0x28] sm:$0xff]   ;;  %782 = vmatprep.mubr.msk.bf16.mxu1 %vm971_vm2, %v970_v29  ;;  %v865_v43 = vld [vmem:[#allocation5 + $0x30] sm:$0xff]   ;;  %v866_v44 = vld [vmem:[#allocation5 + $0x38] sm:$0xff]   ;;  %vm658_vm4 = vcmask 195584   ;;  %s973_s8 = smov [#allocation7]   ;;  %vm664_vm5 = vcmask 195768  }
  0x30   :  { %163 = vmatpush1.bf16.msra.mxu0 %v843_v6  ;;  %v702_v48 = vld [vmem:[%s1231_s5 + $0x2] ss:$0 sm:$0xff]  ;;  %v703_v52 = vld [vmem:[%s1231_s5 + $0x3] ss:$0 sm:$0xff]  ;;  %v868_v60 = vld [vmem:[%s1230_s4 + $0x8] sm:$0xff]   ;;  %s672_s9 = sshll.u32 %s973_s8, 4  ;;  %s673_s9 = int_to_ptr.vmem [resolvable:$true] %s672_s9 }
  0x31   :  { %164 = vmatprep.subr.bf16.mxu0 %v844_v7  ;;  %v867_v58 = vld [vmem:[%s1230_s4] sm:$0xff]   ;;  %v869_v61 = vld [vmem:[%s1230_s4 + $0x10] sm:$0xff]   ;;  %v870_v62 = vld [vmem:[%s1230_s4 + $0x18] sm:$0xff]   ;;  %s937_s10 = scalar_lea.vmem %s673_s9, 128  ;;  %p942_p3 = scmp.lt.s32.totalorder %s673_s9, %s673_s9 }
  0x32   :  { %769 = vmatpush3.bf16.msra.mxu1 %v860_v30  ;;  %v724_v0 = vld [vmem:[%s1231_s5 + $0x4] ss:$0 sm:$0xff]  ;;  %v872_v3 = vld [vmem:[%s1230_s4 + $0x28] sm:$0xff]   ;;  %v725_v5 = vld [vmem:[%s1231_s5 + $0x5] ss:$0 sm:$0xff]  ;;  %p938_p2 = scmp.ne.s32.totalorder %s673_s9, %s937_s10  ;;  %p943_p4 = scmp.lt.s32.totalorder %s937_s10, %s937_s10 }
  0x33   :  { %770 = vmatprep.subr.bf16.mxu1 %v970_v29  ;;  %v871_v1 = vld [vmem:[%s1230_s4 + $0x20] sm:$0xff]   ;;  %v873_v6 = vld [vmem:[%s1230_s4 + $0x30] sm:$0xff]   ;;  %v726_v17 = vld [vmem:[%s1231_s5 + $0x9] ss:$0 sm:$0xff] }
  0x34   :  { %165 = vmatpush1.bf16.msra.mxu0 %v846_v8  ;;  %v874_v8 = vld [vmem:[%s1230_s4 + $0x38] sm:$0xff]   ;;  %p944_p5 = por %p943_p4, %p942_p3 }
  0x35   :  { %166 = vmatprep.subr.bf16.mxu0 %v847_v9 }
  0x36   :  { %771 = vmatpush3.bf16.msra.mxu1 %v861_v39  ;;  %p945_p6 = pnand %p944_p5, %p938_p2 }
  0x37   :  { %772 = vmatprep.subr.bf16.mxu1 %v970_v29 }
  0x38   :  { %167 = vmatpush1.bf16.msra.mxu0 %v849_v10 }
  0x39   :  { %168 = vmatprep.subr.bf16.mxu0 %v850_v11  ;;  %v704_v11 = vld [vmem:[%s1231_s5 + $0x6] ss:$0 sm:$0xff] }
  0x3a   :  { %773 = vmatpush3.bf16.msra.mxu1 %v862_v40 }
  0x3b   :  { %774 = vmatprep.subr.bf16.mxu1 %v970_v29 }
  0x3c   :  { %169 = vmatpush1.bf16.msra.mxu0 %v852_v12 }
  0x3d   :  { %170 = vmatprep.subr.bf16.mxu0 %v853_v13 }
  0x3e   :  { %775 = vmatpush3.bf16.msra.mxu1 %v863_v41  ;;  %v882_v41 = vld [vmem:[%s1229_s3 + $0x38] sm:$0xff]  }
  0x3f   :  { %776 = vmatprep.subr.bf16.mxu1 %v970_v29 }
  0x40   :  { %171 = vmatpush1.bf16.msra.mxu0 %v855_v14 }
  0x41   :  { %698 = vmatprep.subr.msk.bf16.mxu0 %vm151_vm0, %v856_v15 }
  0x42   :  { %777 = vmatpush3.bf16.msra.mxu1 %v864_v42 }
  0x43   :  { %778 = vmatprep.subr.bf16.mxu1 %v970_v29 }
  0x44   :  { %173 = vmatpush1.bf16.msra.mxu0 %v153_v18 }
  0x45   :  { %786 = vmatprep.subr.bf16.mxu0 %v970_v29 }
  0x46   :  { %779 = vmatpush3.bf16.msra.mxu1 %v865_v43 }
  0x47   :  { %699 = vmatmul.mubr.msk.bf16.vlgmr.msra.gmra.mrb[0].mxu0 %vm147_vm1, %v52_v19  ;;  %780 = vmatprep.subr.bf16.mxu1 %v970_v29 }
  0x48   :  { %802 = vmatprep.mubr.msk.bf16.mxu0 %vm971_vm2, %v970_v29 }
  0x4a   :  { %781 = vmatpush3.bf16.msra.mxu1 %v866_v44 }
  0x4b   :  { %806 = vmatprep.subr.bf16.mxu1 %v970_v29 }
 0x11a   :  { %v192_v21 = vpop.f32.mrb[0].mxu0 }
 0x11b   :  { %v204_v22 = vadd.f32 %v700_v20, %v192_v21  ;;  %v194_v23 = vpop.f32.mrb[1].mxu0 }
 0x11c   :  { %v196_v25 = vpop.f32.mrb[2].mxu0  ;;  %v210_v27 = vadd.f32 %v701_v24, %v194_v23  ;;  %v875_v24 = vld [vmem:[%s1229_s3] sm:$0xff]  }
 0x11d   :  { %213 = vadd.xlane.f32.xlu0 %v204_v22  ;;  %v197_v26 = vpop.f32.mrb[3].mxu0  ;;  %787 = vmatpush3.bf16.msra.mxu0 %v875_v24  ;;  %v876_v25 = vld [vmem:[%s1229_s3 + $0x8] sm:$0xff]  }
 0x11e   :  { %788 = vmatprep.subr.bf16.mxu0 %v970_v29 }
 0x121   :  { %482 = vadd.xlane.f32.xlu0 %v210_v27  ;;  %789 = vmatpush3.bf16.msra.mxu0 %v876_v25 }
 0x122   :  { %790 = vmatprep.subr.bf16.mxu0 %v970_v29 }
 0x1aa   :  { %v214_v31 = vpop.xlane.xlu0 %213 }
 0x1ab   :  { %v216_v32 = vmul.f32 0.0078125, %v214_v31  ;;  %v877_v31 = vld [vmem:[%s1229_s3 + $0x10] sm:$0xff]  }
 0x1ac   :  { %791 = vmatpush3.bf16.msra.mxu0 %v877_v31 }
 0x1ad   :  { %v217_v33 = vsub.f32 %v204_v22, %v216_v32  ;;  %792 = vmatprep.subr.bf16.mxu0 %v970_v29  ;;  %v878_v32 = vld [vmem:[%s1229_s3 + $0x18] sm:$0xff]  }
 0x1ae   :  { %v483_v34 = vpop.xlane.xlu0 %482 }
 0x1af   :  { %v484_v35 = vmul.f32 0.0078125, %v483_v34  ;;  %v218_v36 = vmul.f32 %v217_v33, %v217_v33  ;;  %v880_v34 = vld [vmem:[%s1229_s3 + $0x28] sm:$0xff]  }
 0x1b0   :  { %793 = vmatpush3.bf16.msra.mxu0 %v878_v32 }
 0x1b1   :  { %v485_v37 = vsub.f32 %v210_v27, %v484_v35  ;;  %219 = vadd.xlane.f32.xlu1 %v218_v36  ;;  %794 = vmatprep.subr.bf16.mxu0 %v970_v29 }
 0x1b3   :  { %v486_v38 = vmul.f32 %v485_v37, %v485_v37 }
 0x1b5   :  { %487 = vadd.xlane.f32.xlu1 %v486_v38  ;;  %v881_v38 = vld [vmem:[%s1229_s3 + $0x30] sm:$0xff]  }
 0x23e   :  { %v220_v45 = vpop.xlane.xlu1 %219 }
 0x23f   :  { %v221_v46 = vmul.f32 0.0078125, %v220_v45  ;;  %v713_v45 = vld [vmem:[%s1231_s5 + $0x7] ss:$0 sm:$0xff] }
 0x241   :  { %v222_v47 = vadd.f32 1e-05, %v221_v46 }
 0x242   :  { %v488_v50 = vpop.xlane.xlu1 %487 }
 0x243   :  { %883 = vrsqrt.f32 %v222_v47  ;;  %v489_v54 = vmul.f32 0.0078125, %v488_v50 }
 0x245   :  { %v490_v57 = vadd.f32 1e-05, %v489_v54 }
 0x247   :  { %885 = vrsqrt.f32 %v490_v57 }
 0x24d   :  { %v884_v49 = vpop.eup %883 }
 0x24e   :  { %v228_v51 = vmul.f32 %v884_v49, %v702_v48  ;;  %v714_v48 = vld [vmem:[%s1231_s5 + $0x8] ss:$0 sm:$0xff] }
 0x250   :  { %v229_v53 = vmul.f32 %v228_v51, %v217_v33  ;;  %v879_v33 = vld [vmem:[%s1229_s3 + $0x20] sm:$0xff]  }
 0x251   :  { %v886_v63 = vpop.eup %885  ;;  %795 = vmatpush3.bf16.msra.mxu0 %v879_v33 }
 0x252   :  { %v234_v55 = vadd.f32 %v703_v52, %v229_v53  ;;  %v496_v2 = vmul.f32 %v886_v63, %v724_v0  ;;  %796 = vmatprep.subr.bf16.mxu0 %v970_v29 }
 0x254   :  { %v235_v56 = vmax.f32 %v234_v55, 0.0  ;;  %v497_v4 = vmul.f32 %v496_v2, %v485_v37  ;;  %v735_v55 = vld [vmem:[%s1231_s5 + $0xa] ss:$0 sm:$0xff] }
 0x255   :  { %797 = vmatpush3.bf16.msra.mxu0 %v880_v34 }
 0x256   :  { %v236_v59 = vpack.c.bf16 %v235_v56, %v235_v56  ;;  %v502_v7 = vadd.f32 %v725_v5, %v497_v4  ;;  %798 = vmatprep.subr.bf16.mxu0 %v970_v29  ;;  %v715_v5 = vld [vmem:[%s1231_s5 + $0xd] ss:$0 sm:$0xff] }
 0x258   :  { %783 = vmatmul.mubr.bf16.vlgmr.msra.gmra.mrb[0].mxu1 %v236_v59  ;;  %v503_v9 = vmax.f32 %v502_v7, 0.0 }
 0x259   :  { %807 = vmatpush3.bf16.msra.mxu1 %v867_v58  ;;  %822 = vmatprep.mubr.msk.bf16.mxu1 %vm971_vm2, %v970_v29  ;;  %v736_v58 = vld [vmem:[%s1231_s5 + $0xb] ss:$0 sm:$0xff] }
 0x25a   :  { %808 = vmatprep.subr.bf16.mxu1 %v970_v29  ;;  %v504_v10 = vpack.c.bf16 %v503_v9, %v503_v9  ;;  %799 = vmatpush3.bf16.msra.mxu0 %v881_v38 }
 0x25b   :  { %800 = vmatprep.subr.bf16.mxu0 %v970_v29 }
 0x25d   :  { %809 = vmatpush3.bf16.msra.mxu1 %v868_v60 }
 0x25e   :  { %810 = vmatprep.subr.bf16.mxu1 %v970_v29  ;;  %801 = vmatpush3.bf16.msra.mxu0 %v882_v41 }
 0x261   :  { %811 = vmatpush3.bf16.msra.mxu1 %v869_v61  ;;  %v737_v61 = vld [vmem:[%s1231_s5 + $0xc] ss:$0 sm:$0xff] }
 0x262   :  { %812 = vmatprep.subr.bf16.mxu1 %v970_v29 }
 0x265   :  { %813 = vmatpush3.bf16.msra.mxu1 %v870_v62 }
 0x266   :  { %814 = vmatprep.subr.bf16.mxu1 %v970_v29 }
 0x269   :  { %815 = vmatpush3.bf16.msra.mxu1 %v871_v1  ;;  %v738_v1 = vld [vmem:[%s1231_s5 + $0xe] ss:$0 sm:$0xff] }
 0x26a   :  { %816 = vmatprep.subr.bf16.mxu1 %v970_v29 }
 0x26d   :  { %817 = vmatpush3.bf16.msra.mxu1 %v872_v3 }
 0x26e   :  { %818 = vmatprep.subr.bf16.mxu1 %v970_v29 }
 0x271   :  { %819 = vmatpush3.bf16.msra.mxu1 %v873_v6 }
 0x272   :  { %820 = vmatprep.subr.bf16.mxu1 %v970_v29 }
 0x275   :  { %821 = vmatpush3.bf16.msra.mxu1 %v874_v8 }
 0x278   :  { %823 = vmatmul.mubr.bf16.vlgmr.msra.gmra.mrb[4].mxu1 %v504_v10 }
 0x32b   :  { %v340_v12 = vpop.f32.mrb[0].mxu1 }
 0x32c   :  { %v341_v13 = vadd.f32 %v704_v11, %v340_v12  ;;  %v784_v14 = vpop.f32.mrb[1].mxu1 }
 0x32d   :  { %v343_v15 = vpop.f32.mrb[2].mxu1 }
 0x32e   :  { %v785_v16 = vpop.f32.mrb[3].mxu1  ;;  %348 = vadd.xlane.f32.xlu0 %v341_v13 }
 0x34b   :  { %v608_v18 = vpop.f32.mrb[4].mxu1 }
 0x34c   :  { %v609_v19 = vadd.f32 %v726_v17, %v608_v18  ;;  %v824_v20 = vpop.f32.mrb[5].mxu1 }
 0x34d   :  { %v611_v21 = vpop.f32.mrb[6].mxu1 }
 0x34e   :  { %v825_v22 = vpop.f32.mrb[7].mxu1  ;;  %v617_v23 = vsel %vm616_vm3, %v609_v19, 0.0 }
 0x34f   :  { %618 = vadd.xlane.f32.xlu1 %v617_v23 }
 0x3bb   :  { %v349_v26 = vpop.xlane.xlu0 %348 }
 0x3bc   :  { %v350_v27 = vmul.f32 0.0078125, %v349_v26 }
 0x3be   :  { %v351_v28 = vsub.f32 %v341_v13, %v350_v27 }
 0x3c0   :  { %v352_v30 = vmul.f32 %v351_v28, %v351_v28 }
 0x3c2   :  { %353 = vadd.xlane.f32.xlu0 %v352_v30 }
 0x3dc   :  { %v619_v35 = vpop.xlane.xlu1 %618 }
 0x3dd   :  { %v621_v36 = vmul.f32 0.015625, %v619_v35 }
 0x3df   :  { %v622_v37 = vsub.f32 %v609_v19, %v621_v36 }
 0x3e1   :  { %v623_v39 = vmul.f32 %v622_v37, %v622_v37 }
 0x3e3   :  { %v624_v40 = vsel %vm616_vm3, %v623_v39, 0.0 }
 0x3e4   :  { %625 = vadd.xlane.f32.xlu1 %v624_v40 }
 0x44f   :  { %v354_v42 = vpop.xlane.xlu0 %353 }
 0x450   :  { %v355_v43 = vmul.f32 0.0078125, %v354_v42 }
 0x452   :  { %v356_v44 = vadd.f32 1e-05, %v355_v43 }
 0x454   :  { %887 = vrsqrt.f32 %v356_v44 }
 0x45e   :  { %v888_v46 = vpop.eup %887 }
 0x45f   :  { %v362_v47 = vmul.f32 %v888_v46, %v713_v45 }
 0x461   :  { %v363_v49 = vmul.f32 %v362_v47, %v351_v28 }
 0x463   :  { %v368_v50 = vadd.f32 %v714_v48, %v363_v49 }
 0x465   :  { %v369_v51 = vmax.f32 %v368_v50, 0.0 }
 0x467   :  { %v370_v52 = vpack.c.bf16 %v369_v51, %v369_v51 }
 0x469   :  { %803 = vmatmul.mubr.bf16.vlgmr.msra.gmra.mrb[4].mxu0 %v370_v52 }
 0x471   :  { %v626_v29 = vpop.xlane.xlu1 %625 }
 0x472   :  { %v627_v53 = vmul.f32 0.015625, %v626_v29 }
 0x474   :  { %v628_v54 = vadd.f32 1e-05, %v627_v53 }
 0x476   :  { %889 = vrsqrt.f32 %v628_v54 }
 0x480   :  { %v890_v56 = vpop.eup %889 }
 0x481   :  { %v634_v57 = vmul.f32 %v890_v56, %v735_v55 }
 0x483   :  { %v635_v59 = vmul.f32 %v634_v57, %v622_v37 }
 0x485   :  { %v640_v60 = vadd.f32 %v736_v58, %v635_v59 }
 0x487   :  { %v641_v62 = vmax.f32 %v640_v60, 0.0 }
 0x489   :  { %v647_v63 = vmul.f32 %v737_v61, %v641_v62 }
 0x48b   :  { %v648_v0 = vsel %vm616_vm3, %v647_v63, 0.0 }
 0x48c   :  { %649 = vadd.xlane.f32.xlu0 %v648_v0 }
 0x519   :  { %v650_v2 = vpop.xlane.xlu0 %649 }
 0x51a   :  { %v656_v3 = vadd.f32 %v738_v1, %v650_v2 }
 0x51c   :  { %891 = vtanh.f32 %v656_v3 }
 0x526   :  { %v892_v4 = vpop.eup %891 }
 0x527   :  { %661 = vrot.lane.b32.xlu1 %v892_v4, %s972_s1 }
 0x53c   :  { %v474_v6 = vpop.f32.mrb[4].mxu0 }
 0x53d   :  { %v475_v7 = vadd.f32 %v715_v5, %v474_v6  ;;  %v804_v8 = vpop.f32.mrb[5].mxu0 }
 0x53e   :  { %v477_v9 = vpop.f32.mrb[6].mxu0 }
 0x53f   :  { %659 = vst.msk [vmem:[#allocation7] sm:$0xff] %vm658_vm4, %v475_v7  ;;  %v805_v10 = vpop.f32.mrb[7].mxu0 }
 0x599   :  { %v662_v11 = vpop.permute.xlu1 %661 }
 0x59a   :  { %665 = vst.msk [vmem:[#allocation7] sm:$0xff] %vm664_vm5, %v662_v11 }
 0x59b   :  { %948 = shalt.err (!%p945_p6)
}
 0x59c   :  { %s949_s12 = scalar_lea.hbm %s1232_s6, 128 }
 0x59d   :  { %p950_p7 = scmp.ne.s32.totalorder %s1232_s6, %s949_s12  ;;  %p953_p8 = scmp.lt.u32.totalorder %s949_s12, %s1232_s6 }
 0x59f   :  { %p955_p9 = pnand %p953_p8, %p950_p7 }
 0x5a1   :  { %958 = shalt.err (!%p955_p9)
}
 0x5a2   :  { %675 = dma.vmem_to_hbm [thread:$0]  %s673_s9, 128, %s1232_s6, [#allocation4]  }
 0x5a3   :  { %963 = dma.done.wait [#allocation4], 128  }
 0x5a4   :  { %964 = vsyncadd [#allocation4], 4294967168 }
 0x5a5   :  { %679 = vsyncpa [#allocation3], 1 }
 0x5a6   :  { %680 = vsyncpa [#allocation6], 1 }
 0x5a7   :  { %681 = vsyncpa [#allocation4], 1 }

</bundles_post_ra>
